<compile_context>
chip_gen: v6e
topology: v6e:2x2x1
jax: 0.10.0
libtpu: 0.0.40
codegen_flags: <defaults>
</compile_context>

<pallas_src>
import jax
import jax.numpy as jnp
from jax.experimental import pallas as pl
from jax.experimental.pallas import tpu as pltpu

LN_EPS = 1e-12


def _round_up(x, m):
    return ((x + m - 1) // m) * m


def _bert_emb_kernel(ids_ref,        # SMEM (N_pad,) int32   (scalar prefetch)
                     word_hbm,       # HBM  (V, H) f32       (pl.ANY, manual DMA)
                     ttid_ref,       # VMEM (T, 1) int32     token-type ids tile
                     tt_tab_ref,     # VMEM (2, H) f32       token-type table (resident)
                     gamma_ref,      # VMEM (1, H) f32
                     beta_ref,       # VMEM (1, H) f32
                     out_ref,        # VMEM (T, H) f32       output tile
                     gbuf,           # VMEM (2, T, H) f32    double-buffered gathered rows
                     sems):          # DMA semaphores (2,)   one per buffer slot
    T, H = out_ref.shape
    V = word_hbm.shape[0]

    i = pl.program_id(0)
    n = pl.num_programs(0)
    slot = i % 2

    def issue_gathers(tile_idx, dst_slot):
        base = tile_idx * T

        @pl.loop(0, T)
        def _(t):
            row = jnp.clip(ids_ref[base + t], 0, V - 1)   # guard out-of-range ids
            pltpu.make_async_copy(word_hbm.at[pl.ds(row, 1), :],
                                  gbuf.at[dst_slot].at[pl.ds(t, 1), :],
                                  sems.at[dst_slot]).start()

    # Prime the pipeline on the first step.
    @pl.when(i == 0)
    def _():
        issue_gathers(0, 0)

    # Prefetch next tile's gathers into the other slot (hides under this
    # step's compute + output writeback).
    @pl.when(i + 1 < n)
    def _():
        issue_gathers(i + 1, 1 - slot)

    # Drain this slot's semaphore: T waits of H*4 bytes == all T gathers done.
    @pl.loop(0, T)
    def _(t):
        pltpu.make_async_copy(word_hbm.at[pl.ds(0, 1), :],
                              gbuf.at[slot].at[pl.ds(t, 1), :],
                              sems.at[slot]).wait()

    # Token-type embedding: table has only 2 rows, select in-register (VPU).
    x = gbuf[slot]                                       # (T, H) f32
    tt = ttid_ref[...].astype(jnp.float32)               # (T, 1) in {0, 1}
    row0 = tt_tab_ref[0:1, :]                            # (1, H)
    row1 = tt_tab_ref[1:2, :]                            # (1, H)
    x = x + row0 + tt * (row1 - row0)

    # Fused single-pass LayerNorm over H.
    h_inv = jnp.float32(1.0 / H)
    mean = jnp.sum(x, axis=-1, keepdims=True) * h_inv
    msq = jnp.sum(x * x, axis=-1, keepdims=True) * h_inv
    var = msq - mean * mean
    y = (x - mean) * jax.lax.rsqrt(var + LN_EPS)
    out_ref[...] = gamma_ref[...] * y + beta_ref[...]


def bert_embeddings(input_ids, token_type_ids, word_emb, tok_type_emb, ln_w, ln_b,
                    *, tile_tokens=128):
    """input_ids, token_type_ids: (B, S) int. Returns (B, S, H) float32."""
    B, S = input_ids.shape
    V, H = word_emb.shape
    N = B * S

    # Tokens per grid step: sublane-dense (multiple of 8), capped by tile_tokens.
    T = _round_up(min(tile_tokens, _round_up(N, 8)), 8)
    N_pad = _round_up(N, T)
    n_steps = N_pad // T

    ids = input_ids.reshape(N).astype(jnp.int32)
    tts = token_type_ids.reshape(N).astype(jnp.int32)
    if N_pad != N:
        pad = N_pad - N
        ids = jnp.concatenate([ids, jnp.zeros((pad,), jnp.int32)])
        tts = jnp.concatenate([tts, jnp.zeros((pad,), jnp.int32)])
    tts2d = tts.reshape(N_pad, 1)

    word_emb = word_emb.astype(jnp.float32)
    tok_type_emb = tok_type_emb.astype(jnp.float32)
    gamma2d = ln_w.reshape(1, H).astype(jnp.float32)
    beta2d = ln_b.reshape(1, H).astype(jnp.float32)

    grid_spec = pltpu.PrefetchScalarGridSpec(
        num_scalar_prefetch=1,                      # ids -> SMEM, drives gathers
        grid=(n_steps,),
        in_specs=[
            pl.BlockSpec(memory_space=pl.ANY),                  # word table in HBM
            pl.BlockSpec((T, 1), lambda i, ids: (i, 0)),        # token-type ids tile
            pl.BlockSpec((2, H), lambda i, ids: (0, 0)),        # token-type table (VMEM)
            pl.BlockSpec((1, H), lambda i, ids: (0, 0)),        # gamma
            pl.BlockSpec((1, H), lambda i, ids: (0, 0)),        # beta
        ],
        out_specs=pl.BlockSpec((T, H), lambda i, ids: (i, 0)),
        scratch_shapes=[
            pltpu.VMEM((2, T, H), jnp.float32),     # double-buffered gathered rows
            pltpu.SemaphoreType.DMA((2,)),          # one sem per buffer slot
        ],
    )

    out_flat = pl.pallas_call(
        _bert_emb_kernel,
        out_shape=jax.ShapeDtypeStruct((N_pad, H), jnp.float32),
        grid_spec=grid_spec,
        compiler_params=pltpu.CompilerParams(
            # cross-step double-buffer state => sequential grid axis
            dimension_semantics=("arbitrary",),
        ),
    )(ids, word_emb, tts2d, tok_type_emb, gamma2d, beta2d)

    return out_flat[:N].reshape(B, S, H)


def _reference(input_ids, token_type_ids, word_emb, tok_type_emb, ln_w, ln_b):
    we = word_emb[input_ids]
    tte = tok_type_emb[token_type_ids]
    x = we + tte
    u = jnp.mean(x, axis=-1, keepdims=True)
    s = jnp.mean((x - u) ** 2, axis=-1, keepdims=True)
    x = (x - u) / jnp.sqrt(s + LN_EPS)
    return ln_w * x + ln_b


if __name__ == "__main__":
    # Small, module-consistent shapes.
    VOCAB, HIDDEN = 32, 128
    BATCH, SEQ = 2, 8

    key = jax.random.PRNGKey(0)
    k_we, k_tt, k_ids, k_seg = jax.random.split(key, 4)

    # Deterministic parameter init (BERT-style N(0, 0.02) for embeddings,
    # ones/zeros for LayerNorm).
    word_emb = (0.02 * jax.random.normal(k_we, (VOCAB, HIDDEN))).astype(jnp.float32)
    tok_type_emb = (0.02 * jax.random.normal(k_tt, (2, HIDDEN))).astype(jnp.float32)
    ln_w = jnp.ones((HIDDEN,), jnp.float32)
    ln_b = jnp.zeros((HIDDEN,), jnp.float32)

    input_ids = jax.random.randint(k_ids, (BATCH, SEQ), 0, VOCAB, dtype=jnp.int32)
    token_type_ids = jax.random.randint(k_seg, (BATCH, SEQ), 0, 2, dtype=jnp.int32)

    out = bert_embeddings(input_ids, token_type_ids,
                          word_emb, tok_type_emb, ln_w, ln_b)
    out = jax.block_until_ready(out)

    ref = _reference(input_ids, token_type_ids, word_emb, tok_type_emb, ln_w, ln_b)
    assert out.shape == (BATCH, SEQ, HIDDEN)
    assert jnp.allclose(out, ref, atol=1e-4, rtol=1e-4), \
        f"max abs err {jnp.max(jnp.abs(out - ref))}"
    print("KERNEL_OK")
</pallas_src>

<mosaic_0001>
module attributes {stable_mosaic.version = 11 : i64} {
  func.func @_bert_emb_kernel(%arg0: i32, %arg1: memref<16xi32, #tpu.memory_space<smem>>, %arg2: memref<32x128xf32, #tpu.memory_space<any>>, %arg3: memref<16x1xi32, #tpu.memory_space<vmem>>, %arg4: memref<2x128xf32, #tpu.memory_space<vmem>>, %arg5: memref<1x128xf32, #tpu.memory_space<vmem>>, %arg6: memref<1x128xf32, #tpu.memory_space<vmem>>, %arg7: memref<16x128xf32, #tpu.memory_space<vmem>>, %arg8: memref<2x16x128xf32, #tpu.memory_space<vmem>>, %arg9: memref<2x!tpu.dma_semaphore, #tpu.memory_space<semaphore_mem>>) attributes {dimension_semantics = [#tpu.dimension_semantics<arbitrary>], iteration_bounds = array<i64: 1>, scalar_prefetch = 1 : i64, scratch_operands = 2 : i64, tpu.core_type = #tpu.core_type<tc>, window_params = [{}, {transform_indices = @transform_1, window_bounds = array<i64: 16, 1>}, {pipeline_mode = #tpu.pipeline_mode<synchronous>, transform_indices = @transform_2, window_bounds = array<i64: 2, 128>}, {pipeline_mode = #tpu.pipeline_mode<synchronous>, transform_indices = @transform_3, window_bounds = array<i64: 1, 128>}, {pipeline_mode = #tpu.pipeline_mode<synchronous>, transform_indices = @transform_4, window_bounds = array<i64: 1, 128>}, {transform_indices = @transform_5, window_bounds = array<i64: 16, 128>}]} {
    %c2_i32 = arith.constant 2 : i32
    %c0_i32 = arith.constant 0 : i32
    %0 = arith.cmpi eq, %c2_i32, %c0_i32 : i32
    %c1_i32 = arith.constant 1 : i32
    %1 = arith.select %0, %c1_i32, %c2_i32 : i32
    %2 = arith.remsi %arg0, %1 : i32
    %c0_i32_0 = arith.constant 0 : i32
    %3 = arith.cmpi ne, %2, %c0_i32_0 : i32
    %c0_i32_1 = arith.constant 0 : i32
    %4 = arith.cmpi slt, %2, %c0_i32_1 : i32
    %c0_i32_2 = arith.constant 0 : i32
    %5 = arith.cmpi slt, %1, %c0_i32_2 : i32
    %6 = arith.xori %4, %5 : i1
    %7 = arith.andi %6, %3 : i1
    %8 = arith.addi %2, %1 : i32
    %9 = arith.select %7, %8, %2 : i32
    %c0_i32_3 = arith.constant 0 : i32
    %10 = arith.cmpi eq, %arg0, %c0_i32_3 : i32
    %11 = arith.extui %10 : i1 to i32
    %c0_i32_4 = arith.constant 0 : i32
    %12 = arith.cmpi ne, %11, %c0_i32_4 : i32
    scf.if %12 {
      %c0_i32_27 = arith.constant 0 : i32
      %c16_i32_28 = arith.constant 16 : i32
      %57 = arith.addi %c0_i32_27, %c16_i32_28 : i32
      %c1_i32_29 = arith.constant 1 : i32
      scf.for %arg10 = %c0_i32_27 to %57 step %c1_i32_29  : i32 {
        %c1_i32_31 = arith.constant 1 : i32
        %58 = arith.muli %arg10, %c1_i32_31 : i32
        %c0_i32_32 = arith.constant 0 : i32
        %59 = arith.addi %c0_i32_32, %58 : i32
        %c0_i32_33 = arith.constant 0 : i32
        %60 = arith.addi %c0_i32_33, %59 : i32
        %61 = arith.index_cast %60 : i32 to index
        %62 = memref.load %arg1[%61] : memref<16xi32, #tpu.memory_space<smem>>
        %c0_i32_34 = arith.constant 0 : i32
        %c31_i32 = arith.constant 31 : i32
        %63 = arith.maxsi %c0_i32_34, %62 : i32
        %64 = arith.minsi %c31_i32, %63 : i32
        %c0_i32_35 = arith.constant 0 : i32
        %c0_i32_36 = arith.constant 0 : i32
        %c0_i32_37 = arith.constant 0 : i32
        %65 = tpu.memref_slice %arg2[%64, %c0_i32_37] : memref<32x128xf32, #tpu.memory_space<any>> -> memref<1x128xf32, #tpu.memory_space<any>>
        %c0_i32_38 = arith.constant 0 : i32
        %c0_i32_39 = arith.constant 0 : i32
        %66 = tpu.memref_slice %arg8[%c0_i32_35, %c0_i32_38, %c0_i32_39] : memref<2x16x128xf32, #tpu.memory_space<vmem>> -> memref<1x16x128xf32, #tpu.memory_space<vmem>>
        %67 = tpu.memref_squeeze %66 : memref<1x16x128xf32, #tpu.memory_space<vmem>> -> memref<16x128xf32, #tpu.memory_space<vmem>>
        %c0_i32_40 = arith.constant 0 : i32
        %68 = tpu.memref_slice %67[%59, %c0_i32_40] : memref<16x128xf32, #tpu.memory_space<vmem>> -> memref<1x128xf32, #tpu.memory_space<vmem>>
        %69 = tpu.memref_slice %arg9[%c0_i32_36] : memref<2x!tpu.dma_semaphore, #tpu.memory_space<semaphore_mem>> -> memref<1x!tpu.dma_semaphore, #tpu.memory_space<semaphore_mem>>
        %70 = tpu.memref_squeeze %69 : memref<1x!tpu.dma_semaphore, #tpu.memory_space<semaphore_mem>> -> memref<!tpu.dma_semaphore, #tpu.memory_space<semaphore_mem>>
        tpu.enqueue_dma source(%65 : memref<1x128xf32, #tpu.memory_space<any>>) target(%68 : memref<1x128xf32, #tpu.memory_space<vmem>>) target_semaphore(%70 : memref<!tpu.dma_semaphore, #tpu.memory_space<semaphore_mem>>)
      }
      %c16_i32_30 = arith.constant 16 : i32
    } else {
    }
    %c1_i32_5 = arith.constant 1 : i32
    %13 = arith.addi %arg0, %c1_i32_5 : i32
    %c1_i32_6 = arith.constant 1 : i32
    %14 = arith.cmpi slt, %13, %c1_i32_6 : i32
    %15 = arith.extui %14 : i1 to i32
    %c0_i32_7 = arith.constant 0 : i32
    %16 = arith.cmpi ne, %15, %c0_i32_7 : i32
    scf.if %16 {
      %c1_i32_27 = arith.constant 1 : i32
      %57 = arith.addi %arg0, %c1_i32_27 : i32
      %c1_i32_28 = arith.constant 1 : i32
      %58 = arith.subi %c1_i32_28, %9 : i32
      %c16_i32_29 = arith.constant 16 : i32
      %59 = arith.muli %57, %c16_i32_29 : i32
      %c0_i32_30 = arith.constant 0 : i32
      %c16_i32_31 = arith.constant 16 : i32
      %60 = arith.addi %c0_i32_30, %c16_i32_31 : i32
      %c1_i32_32 = arith.constant 1 : i32
      scf.for %arg10 = %c0_i32_30 to %60 step %c1_i32_32  : i32 {
        %c1_i32_34 = arith.constant 1 : i32
        %61 = arith.muli %arg10, %c1_i32_34 : i32
        %c0_i32_35 = arith.constant 0 : i32
        %62 = arith.addi %c0_i32_35, %61 : i32
        %63 = arith.addi %59, %62 : i32
        %64 = arith.index_cast %63 : i32 to index
        %65 = memref.load %arg1[%64] : memref<16xi32, #tpu.memory_space<smem>>
        %c0_i32_36 = arith.constant 0 : i32
        %c31_i32 = arith.constant 31 : i32
        %66 = arith.maxsi %c0_i32_36, %65 : i32
        %67 = arith.minsi %c31_i32, %66 : i32
        %c0_i32_37 = arith.constant 0 : i32
        %68 = tpu.memref_slice %arg2[%67, %c0_i32_37] : memref<32x128xf32, #tpu.memory_space<any>> -> memref<1x128xf32, #tpu.memory_space<any>>
        %c0_i32_38 = arith.constant 0 : i32
        %c0_i32_39 = arith.constant 0 : i32
        %69 = tpu.memref_slice %arg8[%58, %c0_i32_38, %c0_i32_39] : memref<2x16x128xf32, #tpu.memory_space<vmem>> -> memref<1x16x128xf32, #tpu.memory_space<vmem>>
        %70 = tpu.memref_squeeze %69 : memref<1x16x128xf32, #tpu.memory_space<vmem>> -> memref<16x128xf32, #tpu.memory_space<vmem>>
        %c0_i32_40 = arith.constant 0 : i32
        %71 = tpu.memref_slice %70[%62, %c0_i32_40] : memref<16x128xf32, #tpu.memory_space<vmem>> -> memref<1x128xf32, #tpu.memory_space<vmem>>
        %72 = tpu.memref_slice %arg9[%58] : memref<2x!tpu.dma_semaphore, #tpu.memory_space<semaphore_mem>> -> memref<1x!tpu.dma_semaphore, #tpu.memory_space<semaphore_mem>>
        %73 = tpu.memref_squeeze %72 : memref<1x!tpu.dma_semaphore, #tpu.memory_space<semaphore_mem>> -> memref<!tpu.dma_semaphore, #tpu.memory_space<semaphore_mem>>
        tpu.enqueue_dma source(%68 : memref<1x128xf32, #tpu.memory_space<any>>) target(%71 : memref<1x128xf32, #tpu.memory_space<vmem>>) target_semaphore(%73 : memref<!tpu.dma_semaphore, #tpu.memory_space<semaphore_mem>>)
      }
      %c16_i32_33 = arith.constant 16 : i32
    } else {
    }
    %c0_i32_8 = arith.constant 0 : i32
    %c16_i32 = arith.constant 16 : i32
    %17 = arith.addi %c0_i32_8, %c16_i32 : i32
    %c1_i32_9 = arith.constant 1 : i32
    scf.for %arg10 = %c0_i32_8 to %17 step %c1_i32_9  : i32 {
      %c1_i32_27 = arith.constant 1 : i32
      %57 = arith.muli %arg10, %c1_i32_27 : i32
      %c0_i32_28 = arith.constant 0 : i32
      %58 = arith.addi %c0_i32_28, %57 : i32
      %c0_i32_29 = arith.constant 0 : i32
      %c0_i32_30 = arith.constant 0 : i32
      %59 = tpu.memref_slice %arg2[%c0_i32_29, %c0_i32_30] : memref<32x128xf32, #tpu.memory_space<any>> -> memref<1x128xf32, #tpu.memory_space<any>>
      %c0_i32_31 = arith.constant 0 : i32
      %c0_i32_32 = arith.constant 0 : i32
      %60 = tpu.memref_slice %arg8[%9, %c0_i32_31, %c0_i32_32] : memref<2x16x128xf32, #tpu.memory_space<vmem>> -> memref<1x16x128xf32, #tpu.memory_space<vmem>>
      %61 = tpu.memref_squeeze %60 : memref<1x16x128xf32, #tpu.memory_space<vmem>> -> memref<16x128xf32, #tpu.memory_space<vmem>>
      %c0_i32_33 = arith.constant 0 : i32
      %62 = tpu.memref_slice %61[%58, %c0_i32_33] : memref<16x128xf32, #tpu.memory_space<vmem>> -> memref<1x128xf32, #tpu.memory_space<vmem>>
      %63 = tpu.memref_slice %arg9[%9] : memref<2x!tpu.dma_semaphore, #tpu.memory_space<semaphore_mem>> -> memref<1x!tpu.dma_semaphore, #tpu.memory_space<semaphore_mem>>
      %64 = tpu.memref_squeeze %63 : memref<1x!tpu.dma_semaphore, #tpu.memory_space<semaphore_mem>> -> memref<!tpu.dma_semaphore, #tpu.memory_space<semaphore_mem>>
      tpu.wait_dma2 semaphore(%64 : memref<!tpu.dma_semaphore, #tpu.memory_space<semaphore_mem>>) src(%59 : memref<1x128xf32, #tpu.memory_space<any>>) dst(%62 : memref<1x128xf32, #tpu.memory_space<vmem>>)
    }
    %c16_i32_10 = arith.constant 16 : i32
    %18 = arith.index_cast %9 : i32 to index
    %c0 = arith.constant 0 : index
    %c0_11 = arith.constant 0 : index
    %19 = vector.load %arg8[%18, %c0, %c0_11] : memref<2x16x128xf32, #tpu.memory_space<vmem>>, vector<1x16x128xf32>
    %20 = vector.shape_cast %19 : vector<1x16x128xf32> to vector<16x128xf32>
    %c0_12 = arith.constant 0 : index
    %c0_13 = arith.constant 0 : index
    %21 = vector.load %arg3[%c0_12, %c0_13] : memref<16x1xi32, #tpu.memory_space<vmem>>, vector<16x1xi32>
    %22 = arith.sitofp %21 : vector<16x1xi32> to vector<16x1xf32>
    %c0_14 = arith.constant 0 : index
    %c0_15 = arith.constant 0 : index
    %23 = vector.load %arg4[%c0_14, %c0_15] : memref<2x128xf32, #tpu.memory_space<vmem>>, vector<1x128xf32>
    %c1 = arith.constant 1 : index
    %c0_16 = arith.constant 0 : index
    %24 = vector.load %arg4[%c1, %c0_16] : memref<2x128xf32, #tpu.memory_space<vmem>>, vector<1x128xf32>
    %25 = vector.broadcast %23 : vector<1x128xf32> to vector<16x128xf32>
    %26 = arith.addf %20, %25 : vector<16x128xf32>
    %27 = arith.subf %24, %23 : vector<1x128xf32>
    %28 = vector.broadcast %22 : vector<16x1xf32> to vector<16x128xf32>
    %29 = vector.broadcast %27 : vector<1x128xf32> to vector<16x128xf32>
    %30 = arith.mulf %28, %29 : vector<16x128xf32>
    %31 = arith.addf %26, %30 : vector<16x128xf32>
    %cst = arith.constant dense<0.000000e+00> : vector<16xf32>
    %32 = vector.multi_reduction <add>, %31, %cst [1] : vector<16x128xf32> to vector<16xf32>
    %33 = vector.shape_cast %32 : vector<16xf32> to vector<16x1xf32>
    %cst_17 = arith.constant 7.812500e-03 : f32
    %34 = vector.broadcast %cst_17 : f32 to vector<16x1xf32>
    %35 = arith.mulf %33, %34 : vector<16x1xf32>
    %36 = arith.mulf %31, %31 : vector<16x128xf32>
    %cst_18 = arith.constant dense<0.000000e+00> : vector<16xf32>
    %37 = vector.multi_reduction <add>, %36, %cst_18 [1] : vector<16x128xf32> to vector<16xf32>
    %38 = vector.shape_cast %37 : vector<16xf32> to vector<16x1xf32>
    %cst_19 = arith.constant 7.812500e-03 : f32
    %39 = vector.broadcast %cst_19 : f32 to vector<16x1xf32>
    %40 = arith.mulf %38, %39 : vector<16x1xf32>
    %41 = arith.mulf %35, %35 : vector<16x1xf32>
    %42 = arith.subf %40, %41 : vector<16x1xf32>
    %43 = vector.broadcast %35 : vector<16x1xf32> to vector<16x128xf32>
    %44 = arith.subf %31, %43 : vector<16x128xf32>
    %cst_20 = arith.constant 9.99999996E-13 : f32
    %45 = vector.broadcast %cst_20 : f32 to vector<16x1xf32>
    %46 = arith.addf %42, %45 : vector<16x1xf32>
    %47 = math.rsqrt %46 : vector<16x1xf32>
    %48 = vector.broadcast %47 : vector<16x1xf32> to vector<16x128xf32>
    %49 = arith.mulf %44, %48 : vector<16x128xf32>
    %c0_21 = arith.constant 0 : index
    %c0_22 = arith.constant 0 : index
    %50 = vector.load %arg5[%c0_21, %c0_22] : memref<1x128xf32, #tpu.memory_space<vmem>>, vector<1x128xf32>
    %51 = vector.broadcast %50 : vector<1x128xf32> to vector<16x128xf32>
    %52 = arith.mulf %51, %49 : vector<16x128xf32>
    %c0_23 = arith.constant 0 : index
    %c0_24 = arith.constant 0 : index
    %53 = vector.load %arg6[%c0_23, %c0_24] : memref<1x128xf32, #tpu.memory_space<vmem>>, vector<1x128xf32>
    %54 = vector.broadcast %53 : vector<1x128xf32> to vector<16x128xf32>
    %55 = arith.addf %52, %54 : vector<16x128xf32>
    %c0_25 = arith.constant 0 : index
    %c0_26 = arith.constant 0 : index
    %56 = vector.load %arg7[%c0_25, %c0_26] : memref<16x128xf32, #tpu.memory_space<vmem>>, vector<16x128xf32>
    tpu.vector_store %arg7[%c0_25, %c0_26], %55 {strides = array<i32>} : memref<16x128xf32, #tpu.memory_space<vmem>>, vector<16x128xf32>,
    return
  }
  func.func @transform_1(%arg0: i32, %arg1: memref<16xi32, #tpu.memory_space<smem>>) -> (i32, i32) {
    %c0_i32 = arith.constant 0 : i32
    %c0_i32_0 = arith.constant 0 : i32
    return %arg0, %c0_i32 : i32, i32
  }
  func.func @transform_2(%arg0: i32, %arg1: memref<16xi32, #tpu.memory_space<smem>>) -> (i32, i32) {
    %c0_i32 = arith.constant 0 : i32
    %c0_i32_0 = arith.constant 0 : i32
    %c0_i32_1 = arith.constant 0 : i32
    return %c0_i32, %c0_i32_0 : i32, i32
  }
  func.func @transform_3(%arg0: i32, %arg1: memref<16xi32, #tpu.memory_space<smem>>) -> (i32, i32) {
    %c0_i32 = arith.constant 0 : i32
    %c0_i32_0 = arith.constant 0 : i32
    %c0_i32_1 = arith.constant 0 : i32
    return %c0_i32, %c0_i32_0 : i32, i32
  }
  func.func @transform_4(%arg0: i32, %arg1: memref<16xi32, #tpu.memory_space<smem>>) -> (i32, i32) {
    %c0_i32 = arith.constant 0 : i32
    %c0_i32_0 = arith.constant 0 : i32
    %c0_i32_1 = arith.constant 0 : i32
    return %c0_i32, %c0_i32_0 : i32, i32
  }
  func.func @transform_5(%arg0: i32, %arg1: memref<16xi32, #tpu.memory_space<smem>>) -> (i32, i32) {
    %c0_i32 = arith.constant 0 : i32
    %c0_i32_0 = arith.constant 0 : i32
    return %arg0, %c0_i32 : i32, i32
  }
}

</mosaic_0001>

<bundles_post_ra>
// kernel: tpu_custom_call.1
= control target key start
LH: loop header
LB: loop body
LE: loop exit
PB: predicated region body
PF: predicated region fallthrough
CT: control target
= control target key end

     0   :  { %s454_s0 = inlined_call_operand.vmem [shape: s32[16], index: 0, kind: input, shape index: {}]   ;;  %s455_s1 = inlined_call_operand.hbm [shape: f32[32,128], index: 1, kind: input, shape index: {}]   ;;  %s456_s2 = inlined_call_operand.vmem [shape: s32[16,1], index: 2, kind: input, shape index: {}]   ;;  %s457_s3 = inlined_call_operand.vmem [shape: f32[2,128], index: 3, kind: input, shape index: {}]   ;;  %s458_s4 = inlined_call_operand.vmem [shape: f32[1,128], index: 4, kind: input, shape index: {}]   ;;  %s459_s5 = inlined_call_operand.vmem [shape: f32[1,128], index: 5, kind: input, shape index: {}]   ;;  %s460_s6 = inlined_call_operand.hbm [shape: f32[16,128], index: 6, kind: output, shape index: {}]  }
   0x1   :  { %s11_s23 = sshll.u32 %s454_s0, 4  ;;  %s12_s23 = int_to_ptr.vmem [resolvable:$true] %s11_s23 }
   0x2   :  { %s294_s24 = scalar_lea.vmem %s12_s23, 16  ;;  %p299_p1 = scmp.lt.s32.totalorder %s12_s23, %s12_s23 }
   0x3   :  { %p295_p0 = scmp.ne.s32.totalorder %s12_s23, %s294_s24  ;;  %p300_p2 = scmp.lt.s32.totalorder %s294_s24, %s294_s24 }
   0x5   :  { %p301_p3 = por %p300_p2, %p299_p1 }
   0x7   :  { %p302_p4 = pnand %p301_p3, %p295_p0 }
   0x9   :  { %305 = shalt.err (!%p302_p4)  }
   0xa   :  { %s370_s25 = smov [#allocation5]  }
   0xb   :  { %14 = dma.vmem_to_smem %s12_s23, 16, %s370_s25, [#allocation4] }
   0xc   :  { %356 = dma.done.wait [#allocation4], 16 }
   0xd   :  { %357 = vsyncadd [#allocation4], 4294967280 }
   0xe   :  { %16 = sfence }
   0xf   :  { %17 = vsyncpa [#allocation7], 0  ;;  %s414_s26 = smov 0  }
  0x10 LB: > { %s44_s0 = sld [smem:[#allocation5 + %s364_s26]]  ;;  %s51_s27 = scalar_lea.vmem [#allocation2], %s364_s26  ;;  %s364_s26 = sphi %s414_s26, %s43_s26  }
  0x11   : > { %s59_s28 = sshll.u32 %s51_s27, 4  ;;  %s308_s12 = scalar_lea.hbm %s455_s1, 512  ;;  %s60_s28 = int_to_ptr.vmem [resolvable:$true] %s59_s28 }
  0x16   : > { %p45_p5 = scmp.gt.s32.totalorder %s44_s0, 0  ;;  %p246_p6 = scmp.lt.s32.totalorder %s44_s0, 31 }
  0x18   : > { %s462_s0 = smov (!%p45_p5, %s44_s0), 0 }
  0x19   : > { %s464_s0 = smov (!%p246_p6, %s462_s0), 31 }
  0x1a   : > { %s251_s29 = sshll.u32 %s464_s0, 4 }
  0x1b   : > { %s50_s8 = scalar_lea.hbm %s455_s1, %s251_s29 }
  0x1c   : > { %s306_s9 = scalar_lea.hbm %s50_s8, 16  ;;  %p309_p8 = scmp.lt.s32.totalorder %s50_s8, %s455_s1 }
  0x1d   : > { %p307_p7 = scmp.ne.s32.totalorder %s50_s8, %s306_s9  ;;  %p310_p9 = scmp.lt.s32.totalorder %s308_s12, %s306_s9 }
  0x1f   : > { %p311_p10 = por %p310_p9, %p309_p8 }
  0x21   : > { %p312_p11 = pnand %p311_p10, %p307_p7 }
  0x23   : > { %315 = shalt.err (!%p312_p11)  }
  0x24   : > { %s316_s15 = scalar_lea.vmem %s60_s28, 16  ;;  %s371_s16 = smov [#allocation2]  }
  0x25   : > { %p317_p12 = scmp.ne.s32.totalorder %s60_s28, %s316_s15  ;;  %s318_s17 = sshll.u32 %s371_s16, 4  ;;  %s319_s17 = int_to_ptr.vmem [resolvable:$false] %s318_s17 }
  0x26   : > { %s320_s18 = scalar_lea.vmem %s319_s17, 512  ;;  %p321_p13 = scmp.lt.s32.totalorder %s60_s28, %s319_s17 }
  0x27   : > { %p322_p0 = scmp.lt.s32.totalorder %s320_s18, %s316_s15 }
  0x29   : > { %p323_p1 = por %p322_p0, %p321_p13 }
  0x2b   : > { %p324_p2 = pnand %p323_p1, %p317_p12 }
  0x2d   : > { %327 = shalt.err (!%p324_p2)  }
  0x2e   : > { %62 = dma.hbm_to_vmem [thread:$0]  %s50_s8, 16, %s60_s28, [#allocation3] }
  0x2f   : > { %s43_s26 = sadd.s32 1, %s364_s26  }
  0x30   : > { %p40_p3 = scmp.ge.s32.totalorder %s43_s26, 16  }
  0x31   :  { %s366_s19 = smov (%p40_p3), 0  }
  0x32   :  { %42 = sbr.rel (!%p40_p3) target bundleno = 16 (0x10), region = 82 }
  0x37 LB: > { %358 = dma.done.wait [#allocation3], 16  ;;  %s368_s19 = sphi %s366_s19, %s104_s19  }
  0x38   : > { %359 = vsyncadd [#allocation3], 4294967280  ;;  %s104_s19 = sadd.s32 1, %s368_s19  }
  0x39   : > { %p101_p4 = scmp.ge.s32.totalorder %s104_s19, 16  }
  0x3a   :  { %v113_v0 = vld [vmem:[%s456_s2] sm:$0xff] (%p101_p4)  ;;  %v114_v1 = vld [vmem:[%s456_s2 + $0x8] sm:$0xff] (%p101_p4)  ;;  %v372_v2 = vmov (%p101_p4), 0   ;;  %v119_v5 = vlaneseq (%p101_p4)  ;;  %s373_s28 = smov (%p101_p4), [#allocation6]  }
  0x3b   :  { %103 = sbr.rel (!%p101_p4) target bundleno = 55 (0x37), region = 104  ;;  %289 = vset.pattern.permute.xlu0 (%p101_p4), %v372_v2  ;;  %v115_v3 = vcvt.s32.f32 (%p101_p4), %v113_v0  ;;  %v116_v4 = vcvt.s32.f32 (%p101_p4), %v114_v1  ;;  %v117_v7 = vld [vmem:[%s457_s3] sm:$0x1] (%p101_p4)  ;;  %v118_v8 = vld [vmem:[%s457_s3 + $0x1] sm:$0x1] (%p101_p4)  ;;  %v112_v16 = vld [vmem:[#allocation2 + $0x8] sm:$0xff] (%p101_p4) }
  0x3c   :  { %v120_v6 = vshrl.u32 (%p101_p4), %v119_v5, 7  ;;  %v125_v10 = vsub.f32 (%p101_p4), %v118_v8, %v117_v7  ;;  %v111_v12 = vld [vmem:[#allocation2] sm:$0xff] (%p101_p4)  ;;  %s195_s29 = sshll.u32 (%p101_p4), %s373_s28, 4  ;;  %s196_s29 = int_to_ptr.vmem [resolvable:$true] %s195_s29 }
  0x3d   :  { %128 = vperm.xlu0 (%p101_p4), %289, %v115_v3   ;;  %v260_v41 = vld [vmem:[%s458_s4] ss:$0 sm:$0xff] (%p101_p4)  ;;  %s328_s30 = scalar_lea.vmem (%p101_p4), %s196_s29, 256  ;;  %p333_p6 = scmp.lt.s32.totalorder (%p101_p4), %s196_s29, %s196_s29 }
  0x3e   :  { %v121_v9 = vsub.s32 (%p101_p4), 0, %v120_v6  ;;  %v261_v43 = vld [vmem:[%s459_s5] ss:$0 sm:$0xff] (%p101_p4)  ;;  %p329_p5 = scmp.ne.s32.totalorder (%p101_p4), %s196_s29, %s328_s30  ;;  %p334_p7 = scmp.lt.s32.totalorder (%p101_p4), %s328_s30, %s328_s30 }
  0x40   :  { %v122_v11 = vrot.slane %v117_v7, %v121_v9  ;;  %v139_v13 = vrot.slane %v125_v10, %v121_v9  ;;  %p335_p8 = por %p334_p7, %p333_p6 }
  0x41   :  { %133 = vperm.xlu0 %289, %v116_v4  }
  0x42   :  { %v123_v14 = vadd.f32 %v122_v11, %v111_v12  ;;  %v124_v19 = vadd.f32 %v122_v11, %v112_v16  ;;  %p336_p9 = pnand %p335_p8, %p329_p5 }
  0xb8   :  { %v129_v15 = vpop.permute.xlu0 %128 }
  0xb9   :  { %v140_v17 = vmul.f32 %v139_v13, %v129_v15 }
  0xbb   :  { %v142_v18 = vadd.f32 %v140_v17, %v123_v14 }
  0xbc   :  { %v134_v20 = vpop.permute.xlu0 %133 }
  0xbd   :  { %v141_v21 = vmul.f32 %v139_v13, %v134_v20  ;;  %144 = vadd.xlane.f32.xlu1 %v142_v18  ;;  %v150_v22 = vmul.f32 %v142_v18, %v142_v18 }
  0xbf   :  { %v143_v23 = vadd.f32 %v141_v21, %v124_v19  ;;  %152 = vadd.xlane.f32.xlu0 %v150_v22 }
  0xc1   :  { %146 = vadd.xlane.f32.xlu1 %v143_v23  ;;  %v151_v24 = vmul.f32 %v143_v23, %v143_v23 }
  0xc5   :  { %154 = vadd.xlane.f32.xlu1 %v151_v24 }
 0x146   :  { %v145_v25 = vpop.xlane.xlu1 %144 }
 0x147   :  { %v148_v26 = vmul.f32 0.0078125, %v145_v25 }
 0x148   :  { %v153_v27 = vpop.xlane.xlu0 %152 }
 0x149   :  { %v158_v28 = vmul.f32 %v148_v26, %v148_v26  ;;  %v156_v29 = vmul.f32 0.0078125, %v153_v27  ;;  %v162_v39 = vsub.f32 %v142_v18, %v148_v26 }
 0x14a   :  { %v147_v30 = vpop.xlane.xlu1 %146 }
 0x14b   :  { %v160_v31 = vsub.f32 %v156_v29, %v158_v28  ;;  %v149_v32 = vmul.f32 0.0078125, %v147_v30 }
 0x14d   :  { %v164_v33 = vadd.f32 1e-12, %v160_v31  ;;  %v159_v35 = vmul.f32 %v149_v32, %v149_v32  ;;  %v163_v45 = vsub.f32 %v143_v23, %v149_v32 }
 0x14e   :  { %v155_v34 = vpop.xlane.xlu1 %154 }
 0x14f   :  { %290 = vrsqrt.f32 %v164_v33  ;;  %v157_v36 = vmul.f32 0.0078125, %v155_v34 }
 0x151   :  { %v161_v37 = vsub.f32 %v157_v36, %v159_v35 }
 0x153   :  { %v165_v38 = vadd.f32 1e-12, %v161_v37 }
 0x155   :  { %292 = vrsqrt.f32 %v165_v38 }
 0x15c   :  { %v291_v40 = vpop.eup %290 }
 0x15d   :  { %v168_v42 = vmul.f32 %v291_v40, %v162_v39 }
 0x15f   :  { %v177_v44 = vmul.f32 %v260_v41, %v168_v42 }
 0x161   :  { %v186_v46 = vadd.f32 %v261_v43, %v177_v44 }
 0x162   :  { %v293_v47 = vpop.eup %292 }
 0x163   :  { %v169_v48 = vmul.f32 %v293_v47, %v163_v45  ;;  %188 = vst [vmem:[#allocation6] sm:$0xff] %v186_v46 }
 0x165   :  { %v178_v49 = vmul.f32 %v260_v41, %v169_v48 }
 0x167   :  { %v187_v50 = vadd.f32 %v261_v43, %v178_v49 }
 0x169   :  { %189 = vst [vmem:[#allocation6 + $0x8] sm:$0xff] %v187_v50 }
 0x16a   :  { %339 = shalt.err (!%p336_p9)
}
 0x16b   :  { %s374_s4 = smov 128   ;;  %s375_s5 = smov 8  }
 0x16c   :  { %201 = dma.vmem_to_hbm [thread:$0]  %s196_s29, 256, %s460_s6, [#allocation7], %s374_s4, %s374_s4, %s375_s5  }
 0x16d   :  { %360 = dma.done.wait [#allocation7], 256  }
 0x16e   :  { %361 = vsyncadd [#allocation7], 4294967040 }
 0x16f   :  { %205 = vsyncpa [#allocation7], 1 }
 0x170   :  { %206 = vsyncmov [#allocation3] }
 0x173   :  { %s207_s9 = vpop.sfrf %206 }
 0x174   :  { %p262_p10 = scmp.ne.s32.totalorder %s207_s9, 0 }
 0x176   :  { %211 = shalt.err (%p262_p10)  }
 0x177   :  { %213 = vsyncmov [#allocation3 + $0x1] }
 0x17a   :  { %s214_s10 = vpop.sfrf %213 }
 0x17b   :  { %p263_p11 = scmp.ne.s32.totalorder %s214_s10, 0 }
 0x17d   :  { %218 = shalt.err (%p263_p11)  }

</bundles_post_ra>
